<compile_context>
chip_gen: v5e
topology: v5e:2x2
jax: 0.10.0
libtpu: 0.0.40
codegen_flags: <defaults>
</compile_context>

<pallas_src>
import functools

import jax
import jax.numpy as jnp
from jax import lax
from jax.experimental import pallas as pl
from jax.experimental.pallas import tpu as pltpu

# OGB full_atom_feature_dims (get_atom_feature_dims())
FULL_ATOM_FEATURE_DIMS = [119, 5, 12, 12, 10, 6, 6, 2, 2]


def _round_up(x, m):
    return (x + m - 1) // m * m


# Static, 8-aligned layout of the concatenated vocabulary (compile-time).
_ALIGNED_DIMS = tuple(_round_up(d, 8) for d in FULL_ATOM_FEATURE_DIMS)
_ALIGNED_OFFSETS = tuple(
    sum(_ALIGNED_DIMS[:i]) for i in range(len(_ALIGNED_DIMS))
)
_V_PAD = sum(_ALIGNED_DIMS)  # 200


def _choose_tile(n, tile_n):
    """Tile of atoms: multiple of 128 lanes, <= tile_n, and (when N is large
    enough) small enough to keep >= 2 grid steps so both v7x TCs get work."""
    half = _round_up(max((n + 1) // 2, 1), 128)
    t = min(_round_up(tile_n, 128), max(half, 128))
    return max(t, 128)


def atom_encoder_kernel(idx_ref, table_ref, out_ref, onehot_ref, *,
                        offs_pad, dims_pad, atoms_major):
    """One grid step processes a tile of TN atoms.

    idx_ref    : [F, TN] int32           raw per-feature indices (feature-major)
    table_ref  : [V_pad, E] f32  (atoms_major) or [E, V_pad] f32 (otherwise)
    out_ref    : [TN, E] f32     (atoms_major) or [E, TN] f32    (otherwise)
    onehot_ref : VMEM scratch [V_pad, TN] f32
    """
    tn = idx_ref.shape[1]

    # Per-feature sliced one-hot writes: each 8-aligned vocab slab is written
    # exactly once per tile.  Raw indices are in-range for their feature (same
    # assumption PyTorch's nn.Embedding makes); padded atoms carry index -1 so
    # every compare is false and their one-hot column is all zeros.
    for f, (off, dpad) in enumerate(zip(offs_pad, dims_pad)):
        idx_f = idx_ref[f:f + 1, :]                               # [1, TN]
        iota_f = lax.broadcasted_iota(jnp.int32, (dpad, tn), 0)   # [dpad, TN]
        onehot_ref[off:off + dpad, :] = (iota_f == idx_f).astype(jnp.float32)

    onehot = onehot_ref[...]  # [V_pad, TN], exact 0/1
    if atoms_major:
        # [TN, E] = onehot^T[TN, V] @ table[V, E]  (single MXU matmul,
        # lane-dense stores since E % 128 == 0; no wrapper transpose needed).
        out_ref[...] = lax.dot_general(
            onehot, table_ref[...],
            dimension_numbers=(((0,), (0,)), ((), ())),
            preferred_element_type=jnp.float32,
        )
    else:
        # [E, TN] = table_T[E, V] @ onehot[V, TN]  (lane-dense output blocks
        # for narrow emb_dim; wrapper transposes once at the end).
        out_ref[...] = jnp.dot(
            table_ref[...], onehot, preferred_element_type=jnp.float32
        )


@functools.partial(jax.jit, static_argnames=("tile_n",))
def atom_encoder_pallas(x_idx, table, *, tile_n=1024):
    """x_idx: [N, F] int, table: [V_pad, E] f32 (8-aligned slabs). -> [N, E]."""
    n, nfeat = x_idx.shape
    v_pad, emb_dim = table.shape
    assert nfeat == len(FULL_ATOM_FEATURE_DIMS)
    assert v_pad == _V_PAD

    tn = _choose_tile(n, tile_n)
    n_pad = _round_up(n, tn)

    idx = x_idx.astype(jnp.int32)
    if n_pad != n:
        # -1 can never match a non-negative iota -> padded atoms embed to 0
        # (and are sliced off below anyway).
        idx = jnp.pad(idx, ((0, n_pad - n), (0, 0)), constant_values=-1)
    idx_t = idx.T  # [F, N_pad], lane-dense per-feature rows.

    atoms_major = (emb_dim % 128 == 0)
    kernel = functools.partial(
        atom_encoder_kernel,
        offs_pad=_ALIGNED_OFFSETS,
        dims_pad=_ALIGNED_DIMS,
        atoms_major=atoms_major,
    )

    grid = (n_pad // tn,)

    # VMEM budget: idx + out double-buffered, resident table, one-hot scratch.
    est = (2 * nfeat * tn * 4 + 2 * v_pad * emb_dim * 4
           + 2 * tn * emb_dim * 4 + v_pad * tn * 4)
    vmem_limit = None
    if est > (12 << 20):  # only raise beyond v5e's 16 MiB scoped default
        vmem_limit = min(int(est * 3 // 2), 64 << 20)
    cparams = pltpu.CompilerParams(
        dimension_semantics=("parallel",),
        vmem_limit_bytes=vmem_limit,
    )
    scratch = [pltpu.VMEM((v_pad, tn), jnp.float32)]

    if atoms_major:
        out = pl.pallas_call(
            kernel,
            out_shape=jax.ShapeDtypeStruct((n_pad, emb_dim), jnp.float32),
            grid_spec=pltpu.PrefetchScalarGridSpec(
                num_scalar_prefetch=0,
                grid=grid,
                in_specs=[
                    pl.BlockSpec((nfeat, tn), lambda i: (0, i)),
                    pl.BlockSpec((v_pad, emb_dim), lambda i: (0, 0)),
                ],
                out_specs=pl.BlockSpec((tn, emb_dim), lambda i: (i, 0)),
                scratch_shapes=scratch,
            ),
            compiler_params=cparams,
        )(idx_t, table)
        return out[:n, :]

    out_t = pl.pallas_call(
        kernel,
        out_shape=jax.ShapeDtypeStruct((emb_dim, n_pad), jnp.float32),
        grid_spec=pltpu.PrefetchScalarGridSpec(
            num_scalar_prefetch=0,
            grid=grid,
            in_specs=[
                pl.BlockSpec((nfeat, tn), lambda i: (0, i)),
                pl.BlockSpec((emb_dim, v_pad), lambda i: (0, 0)),
            ],
            out_specs=pl.BlockSpec((emb_dim, tn), lambda i: (0, i)),
            scratch_shapes=scratch,
        ),
        compiler_params=cparams,
    )(idx_t, table.T)
    # TODO(synk): downstream consumers should take the [E, N] layout directly
    # (or fuse this transpose into their first matmul) to avoid one extra HBM
    # pass over the output when emb_dim is not a multiple of 128.
    return out_t[:, :n].T


def init_atom_encoder_params(emb_dim, key):
    """Deterministic xavier_uniform-style init of the F embedding tables.

    Returns (table [V_pad, E] f32 with 8-aligned zero-padded slabs,
             list of raw per-feature tables)."""
    slabs, tables = [], []
    for i, dim in enumerate(FULL_ATOM_FEATURE_DIMS):
        k = jax.random.fold_in(key, i)
        # xavier_uniform on [dim, emb_dim]: bound = sqrt(6 / (dim + emb_dim))
        bound = (6.0 / (dim + emb_dim)) ** 0.5
        w = jax.random.uniform(
            k, (dim, emb_dim), dtype=jnp.float32, minval=-bound, maxval=bound
        )
        tables.append(w)
        slabs.append(jnp.pad(w, ((0, _ALIGNED_DIMS[i] - dim), (0, 0))))
    table = jnp.concatenate(slabs, axis=0)  # [V_pad, E]
    return table, tables


def atom_encoder_reference(x_idx, tables):
    """Pure-JAX reference mirroring the PyTorch forward."""
    out = 0
    for f in range(x_idx.shape[1]):
        out = out + jnp.take(tables[f], x_idx[:, f], axis=0)
    return out


if __name__ == "__main__":
    key = jax.random.PRNGKey(0)

    def make_inputs(n_atoms, seed):
        cols = []
        for f, dim in enumerate(FULL_ATOM_FEATURE_DIMS):
            kf = jax.random.fold_in(key, seed + f)
            cols.append(
                jax.random.randint(kf, (n_atoms, 1), minval=0, maxval=dim,
                                   dtype=jnp.int32)
            )
        return jnp.concatenate(cols, axis=1)  # [N, F] int32

    # Case 1: narrow emb_dim (lane-dense [E, TN] blocks + wrapper transpose).
    # Case 2: emb_dim % 128 == 0 (direct [TN, E] blocks, no transpose) with
    #         N not a tile multiple, exercising padding and a 2-step grid.
    cases = [(32, 16, 200), (128, 200, 300)]
    for emb_dim, n_atoms, seed in cases:
        table, tables = init_atom_encoder_params(
            emb_dim, jax.random.fold_in(key, 100 + emb_dim)
        )
        x_idx = make_inputs(n_atoms, seed)

        out = atom_encoder_pallas(x_idx, table)
        out = jax.block_until_ready(out)

        ref = atom_encoder_reference(x_idx, tables)
        assert out.shape == (n_atoms, emb_dim)
        assert jnp.allclose(out, ref, atol=1e-5, rtol=1e-5), (
            f"mismatch vs reference at emb_dim={emb_dim}"
        )

    print("KERNEL_OK")
</pallas_src>

<mosaic_0001>
module attributes {stable_mosaic.version = 11 : i64} {
  func.func @atom_encoder_kernel(%arg0: i32, %arg1: memref<9x128xi32, #tpu.memory_space<vmem>>, %arg2: memref<32x208xf32, #tpu.memory_space<vmem>>, %arg3: memref<32x128xf32, #tpu.memory_space<vmem>>, %arg4: memref<208x128xf32, #tpu.memory_space<vmem>>) attributes {dimension_semantics = [#tpu.dimension_semantics<parallel>], iteration_bounds = array<i64: 1>, scalar_prefetch = 0 : i64, scratch_operands = 1 : i64, tpu.core_type = #tpu.core_type<tc>, window_params = [{transform_indices = @transform_0, window_bounds = array<i64: 9, 128>}, {pipeline_mode = #tpu.pipeline_mode<synchronous>, transform_indices = @transform_1, window_bounds = array<i64: 32, 208>}, {transform_indices = @transform_2, window_bounds = array<i64: 32, 128>}]} {
    %c0 = arith.constant 0 : index
    %c0_0 = arith.constant 0 : index
    %0 = vector.load %arg1[%c0, %c0_0] : memref<9x128xi32, #tpu.memory_space<vmem>>, vector<1x128xi32>
    %1 = tpu.iota {dimensions = array<i32: 0>} : vector<120x128xi32>
    %2 = vector.broadcast %0 : vector<1x128xi32> to vector<120x128xi32>
    %3 = arith.cmpi eq, %1, %2 : vector<120x128xi32>
    %4 = arith.extui %3 : vector<120x128xi1> to vector<120x128xi32>
    %5 = arith.sitofp %4 : vector<120x128xi32> to vector<120x128xf32>
    %c0_1 = arith.constant 0 : index
    %c0_2 = arith.constant 0 : index
    %6 = vector.load %arg4[%c0_1, %c0_2] : memref<208x128xf32, #tpu.memory_space<vmem>>, vector<120x128xf32>
    tpu.vector_store %arg4[%c0_1, %c0_2], %5 {strides = array<i32>} : memref<208x128xf32, #tpu.memory_space<vmem>>, vector<120x128xf32>,
    %c1 = arith.constant 1 : index
    %c0_3 = arith.constant 0 : index
    %7 = vector.load %arg1[%c1, %c0_3] : memref<9x128xi32, #tpu.memory_space<vmem>>, vector<1x128xi32>
    %8 = tpu.iota {dimensions = array<i32: 0>} : vector<8x128xi32>
    %9 = vector.broadcast %7 : vector<1x128xi32> to vector<8x128xi32>
    %10 = arith.cmpi eq, %8, %9 : vector<8x128xi32>
    %11 = arith.extui %10 : vector<8x128xi1> to vector<8x128xi32>
    %12 = arith.sitofp %11 : vector<8x128xi32> to vector<8x128xf32>
    %c120 = arith.constant 120 : index
    %c0_4 = arith.constant 0 : index
    %13 = vector.load %arg4[%c120, %c0_4] : memref<208x128xf32, #tpu.memory_space<vmem>>, vector<8x128xf32>
    tpu.vector_store %arg4[%c120, %c0_4], %12 {strides = array<i32>} : memref<208x128xf32, #tpu.memory_space<vmem>>, vector<8x128xf32>,
    %c2 = arith.constant 2 : index
    %c0_5 = arith.constant 0 : index
    %14 = vector.load %arg1[%c2, %c0_5] : memref<9x128xi32, #tpu.memory_space<vmem>>, vector<1x128xi32>
    %15 = tpu.iota {dimensions = array<i32: 0>} : vector<16x128xi32>
    %16 = vector.broadcast %14 : vector<1x128xi32> to vector<16x128xi32>
    %17 = arith.cmpi eq, %15, %16 : vector<16x128xi32>
    %18 = arith.extui %17 : vector<16x128xi1> to vector<16x128xi32>
    %19 = arith.sitofp %18 : vector<16x128xi32> to vector<16x128xf32>
    %c128 = arith.constant 128 : index
    %c0_6 = arith.constant 0 : index
    %20 = vector.load %arg4[%c128, %c0_6] : memref<208x128xf32, #tpu.memory_space<vmem>>, vector<16x128xf32>
    tpu.vector_store %arg4[%c128, %c0_6], %19 {strides = array<i32>} : memref<208x128xf32, #tpu.memory_space<vmem>>, vector<16x128xf32>,
    %c3 = arith.constant 3 : index
    %c0_7 = arith.constant 0 : index
    %21 = vector.load %arg1[%c3, %c0_7] : memref<9x128xi32, #tpu.memory_space<vmem>>, vector<1x128xi32>
    %22 = tpu.iota {dimensions = array<i32: 0>} : vector<16x128xi32>
    %23 = vector.broadcast %21 : vector<1x128xi32> to vector<16x128xi32>
    %24 = arith.cmpi eq, %22, %23 : vector<16x128xi32>
    %25 = arith.extui %24 : vector<16x128xi1> to vector<16x128xi32>
    %26 = arith.sitofp %25 : vector<16x128xi32> to vector<16x128xf32>
    %c144 = arith.constant 144 : index
    %c0_8 = arith.constant 0 : index
    %27 = vector.load %arg4[%c144, %c0_8] : memref<208x128xf32, #tpu.memory_space<vmem>>, vector<16x128xf32>
    tpu.vector_store %arg4[%c144, %c0_8], %26 {strides = array<i32>} : memref<208x128xf32, #tpu.memory_space<vmem>>, vector<16x128xf32>,
    %c4 = arith.constant 4 : index
    %c0_9 = arith.constant 0 : index
    %28 = vector.load %arg1[%c4, %c0_9] : memref<9x128xi32, #tpu.memory_space<vmem>>, vector<1x128xi32>
    %29 = tpu.iota {dimensions = array<i32: 0>} : vector<16x128xi32>
    %30 = vector.broadcast %28 : vector<1x128xi32> to vector<16x128xi32>
    %31 = arith.cmpi eq, %29, %30 : vector<16x128xi32>
    %32 = arith.extui %31 : vector<16x128xi1> to vector<16x128xi32>
    %33 = arith.sitofp %32 : vector<16x128xi32> to vector<16x128xf32>
    %c160 = arith.constant 160 : index
    %c0_10 = arith.constant 0 : index
    %34 = vector.load %arg4[%c160, %c0_10] : memref<208x128xf32, #tpu.memory_space<vmem>>, vector<16x128xf32>
    tpu.vector_store %arg4[%c160, %c0_10], %33 {strides = array<i32>} : memref<208x128xf32, #tpu.memory_space<vmem>>, vector<16x128xf32>,
    %c5 = arith.constant 5 : index
    %c0_11 = arith.constant 0 : index
    %35 = vector.load %arg1[%c5, %c0_11] : memref<9x128xi32, #tpu.memory_space<vmem>>, vector<1x128xi32>
    %36 = tpu.iota {dimensions = array<i32: 0>} : vector<8x128xi32>
    %37 = vector.broadcast %35 : vector<1x128xi32> to vector<8x128xi32>
    %38 = arith.cmpi eq, %36, %37 : vector<8x128xi32>
    %39 = arith.extui %38 : vector<8x128xi1> to vector<8x128xi32>
    %40 = arith.sitofp %39 : vector<8x128xi32> to vector<8x128xf32>
    %c176 = arith.constant 176 : index
    %c0_12 = arith.constant 0 : index
    %41 = vector.load %arg4[%c176, %c0_12] : memref<208x128xf32, #tpu.memory_space<vmem>>, vector<8x128xf32>
    tpu.vector_store %arg4[%c176, %c0_12], %40 {strides = array<i32>} : memref<208x128xf32, #tpu.memory_space<vmem>>, vector<8x128xf32>,
    %c6 = arith.constant 6 : index
    %c0_13 = arith.constant 0 : index
    %42 = vector.load %arg1[%c6, %c0_13] : memref<9x128xi32, #tpu.memory_space<vmem>>, vector<1x128xi32>
    %43 = tpu.iota {dimensions = array<i32: 0>} : vector<8x128xi32>
    %44 = vector.broadcast %42 : vector<1x128xi32> to vector<8x128xi32>
    %45 = arith.cmpi eq, %43, %44 : vector<8x128xi32>
    %46 = arith.extui %45 : vector<8x128xi1> to vector<8x128xi32>
    %47 = arith.sitofp %46 : vector<8x128xi32> to vector<8x128xf32>
    %c184 = arith.constant 184 : index
    %c0_14 = arith.constant 0 : index
    %48 = vector.load %arg4[%c184, %c0_14] : memref<208x128xf32, #tpu.memory_space<vmem>>, vector<8x128xf32>
    tpu.vector_store %arg4[%c184, %c0_14], %47 {strides = array<i32>} : memref<208x128xf32, #tpu.memory_space<vmem>>, vector<8x128xf32>,
    %c7 = arith.constant 7 : index
    %c0_15 = arith.constant 0 : index
    %49 = vector.load %arg1[%c7, %c0_15] : memref<9x128xi32, #tpu.memory_space<vmem>>, vector<1x128xi32>
    %50 = tpu.iota {dimensions = array<i32: 0>} : vector<8x128xi32>
    %51 = vector.broadcast %49 : vector<1x128xi32> to vector<8x128xi32>
    %52 = arith.cmpi eq, %50, %51 : vector<8x128xi32>
    %53 = arith.extui %52 : vector<8x128xi1> to vector<8x128xi32>
    %54 = arith.sitofp %53 : vector<8x128xi32> to vector<8x128xf32>
    %c192 = arith.constant 192 : index
    %c0_16 = arith.constant 0 : index
    %55 = vector.load %arg4[%c192, %c0_16] : memref<208x128xf32, #tpu.memory_space<vmem>>, vector<8x128xf32>
    tpu.vector_store %arg4[%c192, %c0_16], %54 {strides = array<i32>} : memref<208x128xf32, #tpu.memory_space<vmem>>, vector<8x128xf32>,
    %c8 = arith.constant 8 : index
    %c0_17 = arith.constant 0 : index
    %56 = vector.load %arg1[%c8, %c0_17] : memref<9x128xi32, #tpu.memory_space<vmem>>, vector<1x128xi32>
    %57 = tpu.iota {dimensions = array<i32: 0>} : vector<8x128xi32>
    %58 = vector.broadcast %56 : vector<1x128xi32> to vector<8x128xi32>
    %59 = arith.cmpi eq, %57, %58 : vector<8x128xi32>
    %60 = arith.extui %59 : vector<8x128xi1> to vector<8x128xi32>
    %61 = arith.sitofp %60 : vector<8x128xi32> to vector<8x128xf32>
    %c200 = arith.constant 200 : index
    %c0_18 = arith.constant 0 : index
    %62 = vector.load %arg4[%c200, %c0_18] : memref<208x128xf32, #tpu.memory_space<vmem>>, vector<8x128xf32>
    tpu.vector_store %arg4[%c200, %c0_18], %61 {strides = array<i32>} : memref<208x128xf32, #tpu.memory_space<vmem>>, vector<8x128xf32>,
    %c0_19 = arith.constant 0 : index
    %c0_20 = arith.constant 0 : index
    %63 = vector.load %arg4[%c0_19, %c0_20] : memref<208x128xf32, #tpu.memory_space<vmem>>, vector<208x128xf32>
    %c0_21 = arith.constant 0 : index
    %c0_22 = arith.constant 0 : index
    %64 = vector.load %arg2[%c0_21, %c0_22] : memref<32x208xf32, #tpu.memory_space<vmem>>, vector<32x208xf32>
    %cst = arith.constant dense<0.000000e+00> : vector<32x128xf32>
    %65 = tpu.matmul %64, %63, %cst {dimension_numbers = #tpu.dot_dimension_numbers<[1], [0], [0], [1], [0, 0, 1, 1], [], []>} : vector<32x208xf32>, vector<208x128xf32>, vector<32x128xf32> -> vector<32x128xf32>
    %c0_23 = arith.constant 0 : index
    %c0_24 = arith.constant 0 : index
    %66 = vector.load %arg3[%c0_23, %c0_24] : memref<32x128xf32, #tpu.memory_space<vmem>>, vector<32x128xf32>
    tpu.vector_store %arg3[%c0_23, %c0_24], %65 {strides = array<i32>} : memref<32x128xf32, #tpu.memory_space<vmem>>, vector<32x128xf32>,
    return
  }
  func.func @transform_0(%arg0: i32) -> (i32, i32) {
    %c0_i32 = arith.constant 0 : i32
    %c0_i32_0 = arith.constant 0 : i32
    return %c0_i32, %arg0 : i32, i32
  }
  func.func @transform_1(%arg0: i32) -> (i32, i32) {
    %c0_i32 = arith.constant 0 : i32
    %c0_i32_0 = arith.constant 0 : i32
    %c0_i32_1 = arith.constant 0 : i32
    return %c0_i32, %c0_i32_0 : i32, i32
  }
  func.func @transform_2(%arg0: i32) -> (i32, i32) {
    %c0_i32 = arith.constant 0 : i32
    %c0_i32_0 = arith.constant 0 : i32
    return %c0_i32, %arg0 : i32, i32
  }
}

</mosaic_0001>

<bundles_post_ra>
// kernel: atom_encoder_pallas.1
= control target key start
LH: loop header
LB: loop body
LE: loop exit
PB: predicated region body
PF: predicated region fallthrough
CT: control target
= control target key end

     0   :  { %v12_v0 = vlaneseq  ;;  %v360_v9 = vmov 1.0   ;;  %s549_s0 = inlined_call_operand.vmem [shape: s32[9,128], index: 0, kind: input, shape index: {}]   ;;  %s550_s1 = inlined_call_operand.vmem [shape: f32[32,208], index: 1, kind: input, shape index: {}]   ;;  %s551_s2 = inlined_call_operand.vmem [shape: f32[32,128], index: 2, kind: output, shape index: {}]  }
   0x1   :  { %v379_v1 = vld [vmem:[%s549_s0] ss:$0 sm:$0xff]  ;;  %v352_v3 = vld [vmem:[%s549_s0 + $0x1] ss:$0 sm:$0xff]  ;;  %v353_v4 = vld [vmem:[%s549_s0 + $0x8] ss:$0 sm:$0xff] }
   0x2   :  { %v381_v2 = vshrl.u32 %v12_v0, 7  ;;  %v354_v5 = vld [vmem:[%s549_s0 + $0x7] ss:$0 sm:$0xff]  ;;  %v355_v10 = vld [vmem:[%s549_s0 + $0x6] ss:$0 sm:$0xff]  ;;  %v176_v25 = vld [vmem:[%s550_s1 + $0x8] sm:$0xff] }
   0x3   :  { %v356_v12 = vld [vmem:[%s549_s0 + $0x5] ss:$0 sm:$0xff]  ;;  %v357_v14 = vld [vmem:[%s549_s0 + $0x4] ss:$0 sm:$0xff]  ;;  %v358_v17 = vld [vmem:[%s549_s0 + $0x3] ss:$0 sm:$0xff] }
   0x4   :  { %vm91_vm0 = vcmp.eq.s32.totalorder %v381_v2, %v352_v3  ;;  %v27_v6 = vadd.s32 112, %v381_v2  ;;  %v26_v7 = vadd.s32 104, %v381_v2  ;;  %v25_v8 = vadd.s32 96, %v381_v2  ;;  %v359_v20 = vld [vmem:[%s549_s0 + $0x2] ss:$0 sm:$0xff]  ;;  %v178_v27 = vld [vmem:[%s550_s1 + $0x18] sm:$0xff] }
   0x5   :  { %292 = vmatpush.msk.msra.mxu0 %vm91_vm0, %v360_v9  ;;  %318 = vmatpush.msk.msra.mxu2 %vm91_vm0, %v360_v9  ;;  %vm145_vm1 = vcmp.eq.s32.totalorder %v381_v2, %v353_v4  ;;  %vm139_vm2 = vcmp.eq.s32.totalorder %v381_v2, %v354_v5  ;;  %v24_v11 = vadd.s32 88, %v381_v2  ;;  %vm133_vm5 = vcmp.eq.s32.totalorder %v381_v2, %v355_v10  ;;  %v175_v28 = vld [vmem:[%s550_s1] sm:$0xff]  ;;  %v177_v29 = vld [vmem:[%s550_s1 + $0x10] sm:$0xff]  ;;  %v180_v31 = vld [vmem:[%s550_s1 + $0x28] sm:$0xff] }
   0x6   :  { %319 = vmatpush.msk.msra.mxu3 %vm91_vm0, %v360_v9  ;;  %vm43_vm3 = vcmp.eq.s32.totalorder %v27_v6, %v379_v1  ;;  %308 = vmatpush.msk.msra.mxu1 %vm145_vm1, %v360_v9  ;;  %vm42_vm4 = vcmp.eq.s32.totalorder %v26_v7, %v379_v1  ;;  %v415_v13 = vadd.s32 8, %v381_v2  ;;  %vm41_vm6 = vcmp.eq.s32.totalorder %v25_v8, %v379_v1  ;;  %v179_v30 = vld [vmem:[%s550_s1 + $0x20] sm:$0xff]  ;;  %v181_v32 = vld [vmem:[%s550_s1 + $0x30] sm:$0xff]  ;;  %v182_v33 = vld [vmem:[%s550_s1 + $0x38] sm:$0xff] }
   0x7   :  { %293 = vmatpush.msk.msra.mxu0 %vm43_vm3, %v360_v9  ;;  %320 = vmatpush.msk.msra.mxu2 %vm43_vm3, %v360_v9  ;;  %v23_v15 = vadd.s32 80, %v381_v2  ;;  %vm127_vm7 = vcmp.eq.s32.totalorder %v381_v2, %v356_v12  ;;  %vm40_vm8 = vcmp.eq.s32.totalorder %v24_v11, %v379_v1  ;;  %v22_v16 = vadd.s32 72, %v381_v2 }
   0x8   :  { %321 = vmatpush.msk.msra.mxu3 %vm43_vm3, %v360_v9  ;;  %309 = vmatpush.msk.msra.mxu1 %vm139_vm2, %v360_v9  ;;  %vm118_vm9 = vcmp.eq.s32.totalorder %v415_v13, %v357_v14  ;;  %v21_v18 = vadd.s32 64, %v381_v2  ;;  %vm117_vm11 = vcmp.eq.s32.totalorder %v381_v2, %v357_v14  ;;  %v20_v19 = vadd.s32 56, %v381_v2 }
   0x9   :  { %294 = vmatpush.msk.msra.mxu0 %vm42_vm4, %v360_v9  ;;  %322 = vmatpush.msk.msra.mxu2 %vm42_vm4, %v360_v9  ;;  %vm39_vm10 = vcmp.eq.s32.totalorder %v23_v15, %v379_v1  ;;  %vm38_vm12 = vcmp.eq.s32.totalorder %v22_v16, %v379_v1  ;;  %vm108_vm13 = vcmp.eq.s32.totalorder %v415_v13, %v358_v17  ;;  %v19_v21 = vadd.s32 48, %v381_v2 }
   0xa   :  { %323 = vmatpush.msk.msra.mxu3 %vm42_vm4, %v360_v9  ;;  %310 = vmatpush.msk.msra.mxu1 %vm133_vm5, %v360_v9  ;;  %vm37_vm14 = vcmp.eq.s32.totalorder %v21_v18, %v379_v1  ;;  %vm107_vm15 = vcmp.eq.s32.totalorder %v381_v2, %v358_v17  ;;  %vm36_vm0 = vcmp.eq.s32.totalorder %v20_v19, %v379_v1  ;;  %v18_v22 = vadd.s32 40, %v381_v2 }
   0xb   :  { %295 = vmatpush.msk.msra.mxu0 %vm41_vm6, %v360_v9  ;;  %324 = vmatpush.msk.msra.mxu2 %vm41_vm6, %v360_v9  ;;  %vm98_vm1 = vcmp.eq.s32.totalorder %v415_v13, %v359_v20  ;;  %vm35_vm2 = vcmp.eq.s32.totalorder %v19_v21, %v379_v1  ;;  %v17_v23 = vadd.s32 32, %v381_v2  ;;  %vm97_vm3 = vcmp.eq.s32.totalorder %v381_v2, %v359_v20 }
   0xc   :  { %325 = vmatpush.msk.msra.mxu3 %vm41_vm6, %v360_v9  ;;  %311 = vmatpush.msk.msra.mxu1 %vm127_vm7, %v360_v9  ;;  %vm34_vm4 = vcmp.eq.s32.totalorder %v18_v22, %v379_v1  ;;  %v16_v24 = vadd.s32 24, %v381_v2  ;;  %vm183_vm5 = vcmask 654336   ;;  %v15_v26 = vadd.s32 16, %v381_v2 }
   0xd   :  { %296 = vmatpush.msk.msra.mxu0 %vm40_vm8, %v360_v9  ;;  %326 = vmatpush.msk.msra.mxu2 %vm40_vm8, %v360_v9  ;;  %vm33_vm6 = vcmp.eq.s32.totalorder %v17_v23, %v379_v1 }
   0xe   :  { %327 = vmatpush.msk.msra.mxu3 %vm40_vm8, %v360_v9  ;;  %312 = vmatpush.msk.msra.mxu1 %vm118_vm9, %v360_v9  ;;  %vm32_vm7 = vcmp.eq.s32.totalorder %v16_v24, %v379_v1  ;;  %vm31_vm8 = vcmp.eq.s32.totalorder %v15_v26, %v379_v1  ;;  %vm30_vm9 = vcmp.eq.s32.totalorder %v415_v13, %v379_v1 }
   0xf   :  { %297 = vmatpush.msk.msra.mxu0 %vm39_vm10, %v360_v9  ;;  %328 = vmatpush.msk.msra.mxu2 %vm39_vm10, %v360_v9 }
  0x10   :  { %329 = vmatpush.msk.msra.mxu3 %vm39_vm10, %v360_v9  ;;  %313 = vmatpush.msk.msra.mxu1 %vm117_vm11, %v360_v9  ;;  %vm29_vm10 = vcmp.eq.s32.totalorder %v381_v2, %v379_v1 }
  0x11   :  { %298 = vmatpush.msk.msra.mxu0 %vm38_vm12, %v360_v9  ;;  %330 = vmatpush.msk.msra.mxu2 %vm38_vm12, %v360_v9 }
  0x12   :  { %331 = vmatpush.msk.msra.mxu3 %vm38_vm12, %v360_v9  ;;  %314 = vmatpush.msk.msra.mxu1 %vm108_vm13, %v360_v9 }
  0x13   :  { %299 = vmatpush.msk.msra.mxu0 %vm37_vm14, %v360_v9  ;;  %332 = vmatpush.msk.msra.mxu2 %vm37_vm14, %v360_v9 }
  0x14   :  { %333 = vmatpush.msk.msra.mxu3 %vm37_vm14, %v360_v9  ;;  %315 = vmatpush.msk.msra.mxu1 %vm107_vm15, %v360_v9 }
  0x15   :  { %300 = vmatpush.msk.msra.mxu0 %vm36_vm0, %v360_v9  ;;  %334 = vmatpush.msk.msra.mxu2 %vm36_vm0, %v360_v9 }
  0x16   :  { %335 = vmatpush.msk.msra.mxu3 %vm36_vm0, %v360_v9  ;;  %316 = vmatpush.msk.msra.mxu1 %vm98_vm1, %v360_v9 }
  0x17   :  { %301 = vmatpush.msk.msra.mxu0 %vm35_vm2, %v360_v9  ;;  %336 = vmatpush.msk.msra.mxu2 %vm35_vm2, %v360_v9 }
  0x18   :  { %337 = vmatpush.msk.msra.mxu3 %vm35_vm2, %v360_v9  ;;  %317 = vmatpush.msk.msra.mxu1 %vm97_vm3, %v360_v9 }
  0x19   :  { %302 = vmatpush.msk.msra.mxu0 %vm34_vm4, %v360_v9  ;;  %338 = vmatpush.msk.msra.mxu2 %vm34_vm4, %v360_v9 }
  0x1a   :  { %339 = vmatpush.msk.msra.mxu3 %vm34_vm4, %v360_v9  ;;  %288 = vmatmul.msk.f32.vlgmr.msra.gmra.mxu1 %vm183_vm5, %v176_v25 }
  0x1b   :  { %303 = vmatpush.msk.msra.mxu0 %vm33_vm6, %v360_v9  ;;  %340 = vmatpush.msk.msra.mxu2 %vm33_vm6, %v360_v9 }
  0x1c   :  { %341 = vmatpush.msk.msra.mxu3 %vm33_vm6, %v360_v9 }
  0x1d   :  { %304 = vmatpush.msk.msra.mxu0 %vm32_vm7, %v360_v9  ;;  %342 = vmatpush.msk.msra.mxu2 %vm32_vm7, %v360_v9 }
  0x1e   :  { %343 = vmatpush.msk.msra.mxu3 %vm32_vm7, %v360_v9 }
  0x1f   :  { %305 = vmatpush.msk.msra.mxu0 %vm31_vm8, %v360_v9  ;;  %344 = vmatpush.msk.msra.mxu2 %vm31_vm8, %v360_v9 }
  0x20   :  { %345 = vmatpush.msk.msra.mxu3 %vm31_vm8, %v360_v9 }
  0x21   :  { %306 = vmatpush.msk.msra.mxu0 %vm30_vm9, %v360_v9  ;;  %346 = vmatpush.msk.msra.mxu2 %vm30_vm9, %v360_v9 }
  0x22   :  { %347 = vmatpush.msk.msra.mxu3 %vm30_vm9, %v360_v9  ;;  %289 = vmatmul.msk.f32.gmra.mxu1 %vm183_vm5, %v178_v27 }
  0x23   :  { %307 = vmatpush.msk.msra.mxu0 %vm29_vm10, %v360_v9  ;;  %348 = vmatpush.msk.msra.mxu2 %vm29_vm10, %v360_v9 }
  0x24   :  { %349 = vmatpush.msk.msra.mxu3 %vm29_vm10, %v360_v9  ;;  %212 = vmatmul.f32.vlgmr.msra.gmra.mxu0 %v175_v28 }
  0x25   :  { %215 = vmatmul.f32.vlgmr.msra.gmra.mxu2 %v177_v29  ;;  %218 = vmatmul.f32.vlgmr.msra.gmra.mxu3 %v179_v30 }
  0x2a   :  { %290 = vmatmul.msk.f32.gmra.mxu1 %vm183_vm5, %v180_v31 }
  0x2d   :  { %221 = vmatmul.f32.gmra.mxu3 %v181_v32 }
  0x32   :  { %291 = vmatmul.msk.f32.gmra.mxu1 %vm183_vm5, %v182_v33 }
  0x97   :  { %v242_v34 = vpop.f32.mrf.mxu1 }
  0x9f   :  { %v245_v35 = vpop.f32.mrf.mxu1 }
  0xa1   :  { %v213_v36 = vpop.f32.mrf.mxu0 }
  0xa2   :  { %v243_v37 = vadd.f32 %v242_v34, %v213_v36 }
  0xa4   :  { %254 = vst [vmem:[%s551_s2] sm:$0xff] %v243_v37 }
  0xa7   :  { %v248_v38 = vpop.f32.mrf.mxu1 }
  0xa8   :  { %v216_v39 = vpop.f32.mrf.mxu2  ;;  %v219_v40 = vpop.f32.mrf.mxu3 }
  0xa9   :  { %v246_v41 = vadd.f32 %v245_v35, %v216_v39  ;;  %v249_v42 = vadd.f32 %v248_v38, %v219_v40 }
  0xab   :  { %255 = vst [vmem:[%s551_s2 + $0x8] sm:$0xff] %v246_v41 }
  0xac   :  { %256 = vst [vmem:[%s551_s2 + $0x10] sm:$0xff] %v249_v42 }
  0xaf   :  { %v251_v43 = vpop.f32.mrf.mxu1 }
  0xb0   :  { %v222_v44 = vpop.f32.mrf.mxu3 }
  0xb1   :  { %v252_v45 = vadd.f32 %v251_v43, %v222_v44 }
  0xb3   :  { %257 = vst [vmem:[%s551_s2 + $0x18] sm:$0xff] %v252_v45 }

</bundles_post_ra>
